<compile_context>
chip_gen: v5e
topology: v5e:2x2
jax: 0.10.0
libtpu: 0.0.40
codegen_flags: <defaults>
</compile_context>

<pallas_src>
import functools

import jax
import jax.numpy as jnp
from jax.experimental import pallas as pl
from jax.experimental.pallas import tpu as pltpu


def _round_up(x, m):
    return (x + m - 1) // m * m


# ----------------------------------------------------------------------------
# Kernel: one grid step processes a (TM, d_pad) tile of the concatenated input.
#   p_ref layout (rows, all LANE_W=128 lanes wide, fp32, zero padded):
#     [0        : d_pad )  block-diagonal layer-1 weight  (valid: d_tot x 3H)
#     [r1       : r2    )  hidden weight                  (valid: 3H x H)
#     [r2       : r3    )  final fc weight                (valid: H x O)
#     [r3 + 0]             layer-1 bias (valid: 3H)
#     [r3 + 1]             hidden  bias (valid: H)
#     [r3 + 2]             fc      bias (valid: O)
# ----------------------------------------------------------------------------
def addbnet_kernel(x_ref, p_ref, out_ref, *, d_pad, r1, r2, r3):
    f32 = jnp.float32
    x = x_ref[...]                                         # (TM, d_pad)

    # Layer 1: fused block-diagonal branch Linears + ReLU.
    a1 = jnp.maximum(
        jnp.dot(x, p_ref[0:d_pad, :], preferred_element_type=f32)
        + p_ref[r3:r3 + 1, :],
        0.0)                                               # (TM, 128)

    # Hidden layer: concat(x1,x2,x3) @ Wh + bh, ReLU. (padded lanes stay 0)
    h = jnp.maximum(
        jnp.dot(a1, p_ref[r1:r2, :], preferred_element_type=f32)
        + p_ref[r3 + 1:r3 + 2, :],
        0.0)                                               # (TM, 128)

    # Final fc (no activation). Lane-dense 128-wide store; wrapper slices to O.
    out_ref[...] = (
        jnp.dot(h, p_ref[r2:r3, :], preferred_element_type=f32)
        + p_ref[r3 + 2:r3 + 3, :]
    ).astype(out_ref.dtype)


# ----------------------------------------------------------------------------
# Parameter packing: one contiguous, tile-aligned fp32 buffer.
# ----------------------------------------------------------------------------
def pack_params(p):
    w1, w2, w3 = p["w1"], p["w2"], p["w3"]
    wh, wf = p["wh"], p["wf"]
    b1, b2, b3, bh, bf = p["b1"], p["b2"], p["b3"], p["bh"], p["bf"]

    d1, H = w1.shape
    d2, d3 = w2.shape[0], w3.shape[0]
    H3 = 3 * H
    O = wf.shape[1]

    d_tot = d1 + d2 + d3
    d_pad = _round_up(d_tot, 8)                 # sublane alignment (fp32)
    lane_w = _round_up(max(H3, H, O), 128)      # lane-dense width for all slabs

    r1 = d_pad
    r2 = r1 + lane_w
    r3 = r2 + lane_w
    rows = r3 + 8                               # 8-row block for the 3 biases

    packed = jnp.zeros((rows, lane_w), jnp.float32)
    # Block-diagonal layer-1 weight (concat order x1 | x2 | x3).
    packed = packed.at[0:d1, 0:H].set(w1)
    packed = packed.at[d1:d1 + d2, H:2 * H].set(w2)
    packed = packed.at[d1 + d2:d_tot, 2 * H:3 * H].set(w3)
    # Hidden and fc weights.
    packed = packed.at[r1:r1 + H3, 0:H].set(wh)
    packed = packed.at[r2:r2 + H, 0:O].set(wf)
    # Biases.
    packed = packed.at[r3, 0:H3].set(jnp.concatenate([b1[0], b2[0], b3[0]]))
    packed = packed.at[r3 + 1, 0:H].set(bh[0])
    packed = packed.at[r3 + 2, 0:O].set(bf[0])

    meta = dict(d_tot=d_tot, d_pad=d_pad, lane_w=lane_w,
                r1=r1, r2=r2, r3=r3, rows=rows, hidden=H, output=O)
    return packed, meta


# ----------------------------------------------------------------------------
# Wrapper
# ----------------------------------------------------------------------------
def addbnet_forward(dbms1, dbms2, dbms3, params, *, tm_max=512):
    packed, m = pack_params(params)

    B = dbms1.shape[0]
    x = jnp.concatenate([dbms1, dbms2, dbms3], axis=-1).astype(jnp.float32)

    # Batch tile: multiple of 8 sublanes, capped so double-buffered tiles stay
    # comfortably inside the scoped VMEM budget on every generation (incl. v7x).
    TM = min(tm_max, _round_up(B, 8))
    B_pad = _round_up(B, TM)
    x = jnp.pad(x, ((0, B_pad - B), (0, m["d_pad"] - m["d_tot"])))

    kernel = functools.partial(
        addbnet_kernel, d_pad=m["d_pad"], r1=m["r1"], r2=m["r2"], r3=m["r3"])

    H, O = m["hidden"], m["output"]
    flops = 2 * B * (m["d_tot"] * 3 * H + 3 * H * H + H * O)
    bytes_accessed = 4 * (x.size + packed.size + B_pad * m["lane_w"])

    out = pl.pallas_call(
        kernel,
        out_shape=jax.ShapeDtypeStruct((B_pad, m["lane_w"]), jnp.float32),
        grid=(B_pad // TM,),
        in_specs=[
            # activations: stream over batch
            pl.BlockSpec((TM, m["d_pad"]), lambda i: (i, 0)),
            # packed params: resident across the whole grid
            pl.BlockSpec((m["rows"], m["lane_w"]), lambda i: (0, 0)),
        ],
        out_specs=pl.BlockSpec((TM, m["lane_w"]), lambda i: (i, 0)),
        compiler_params=pltpu.CompilerParams(
            dimension_semantics=("parallel",)),
        cost_estimate=pl.CostEstimate(
            flops=flops, transcendentals=0, bytes_accessed=bytes_accessed),
    )(x, packed)

    return out[:B, :O]


# ----------------------------------------------------------------------------
# Init (PyTorch nn.Linear default: U[-1/sqrt(fan_in), +1/sqrt(fan_in)])
# ----------------------------------------------------------------------------
def init_params(key, d1, d2, d3, hidden, output):
    def linear(k, fan_in, fan_out):
        kw, kb = jax.random.split(k)
        bound = 1.0 / jnp.sqrt(jnp.float32(fan_in))
        w = jax.random.uniform(kw, (fan_in, fan_out), jnp.float32, -bound, bound)
        b = jax.random.uniform(kb, (1, fan_out), jnp.float32, -bound, bound)
        return w, b

    k1, k2, k3, kh, kf = jax.random.split(key, 5)
    w1, b1 = linear(k1, d1, hidden)
    w2, b2 = linear(k2, d2, hidden)
    w3, b3 = linear(k3, d3, hidden)
    wh, bh = linear(kh, 3 * hidden, hidden)
    wf, bf = linear(kf, hidden, output)
    return {"w1": w1, "b1": b1, "w2": w2, "b2": b2, "w3": w3, "b3": b3,
            "wh": wh, "bh": bh, "wf": wf, "bf": bf}


def addbnet_reference(dbms1, dbms2, dbms3, p):
    x1 = jax.nn.relu(dbms1 @ p["w1"] + p["b1"])
    x2 = jax.nn.relu(dbms2 @ p["w2"] + p["b2"])
    x3 = jax.nn.relu(dbms3 @ p["w3"] + p["b3"])
    x = jnp.concatenate([x1, x2, x3], axis=-1)
    h = jax.nn.relu(x @ p["wh"] + p["bh"])
    return h @ p["wf"] + p["bf"]


if __name__ == "__main__":
    BATCH = 8
    DBMS1_DIM, DBMS2_DIM, DBMS3_DIM = 12, 16, 20
    HIDDEN_DIM, OUTPUT_DIM = 32, 4

    key = jax.random.PRNGKey(0)
    kp, k1, k2, k3 = jax.random.split(key, 4)

    params = init_params(kp, DBMS1_DIM, DBMS2_DIM, DBMS3_DIM,
                         HIDDEN_DIM, OUTPUT_DIM)

    dbms1 = jax.random.normal(k1, (BATCH, DBMS1_DIM), jnp.float32)
    dbms2 = jax.random.normal(k2, (BATCH, DBMS2_DIM), jnp.float32)
    dbms3 = jax.random.normal(k3, (BATCH, DBMS3_DIM), jnp.float32)

    out = addbnet_forward(dbms1, dbms2, dbms3, params)
    out = jax.block_until_ready(out)

    ref = addbnet_reference(dbms1, dbms2, dbms3, params)
    assert out.shape == (BATCH, OUTPUT_DIM)
    assert jnp.allclose(out, ref, atol=1e-5, rtol=1e-5), "mismatch vs reference"

    print("KERNEL_OK")
</pallas_src>

<mosaic_0001>
module attributes {stable_mosaic.version = 11 : i64} {
  func.func @addbnet_kernel(%arg0: i32, %arg1: memref<8x48xf32, #tpu.memory_space<vmem>>, %arg2: memref<312x128xf32, #tpu.memory_space<vmem>>, %arg3: memref<8x128xf32, #tpu.memory_space<vmem>>) attributes {dimension_semantics = [#tpu.dimension_semantics<parallel>], iteration_bounds = array<i64: 1>, scalar_prefetch = 0 : i64, scratch_operands = 0 : i64, tpu.core_type = #tpu.core_type<tc>, window_params = [{transform_indices = @transform_0, window_bounds = array<i64: 8, 48>}, {pipeline_mode = #tpu.pipeline_mode<synchronous>, transform_indices = @transform_1, window_bounds = array<i64: 312, 128>}, {transform_indices = @transform_2, window_bounds = array<i64: 8, 128>}]} {
    %c0 = arith.constant 0 : index
    %c0_0 = arith.constant 0 : index
    %0 = vector.load %arg1[%c0, %c0_0] : memref<8x48xf32, #tpu.memory_space<vmem>>, vector<8x48xf32>
    %c0_1 = arith.constant 0 : index
    %c0_2 = arith.constant 0 : index
    %1 = vector.load %arg2[%c0_1, %c0_2] : memref<312x128xf32, #tpu.memory_space<vmem>>, vector<48x128xf32>
    %cst = arith.constant dense<0.000000e+00> : vector<8x128xf32>
    %2 = tpu.matmul %0, %1, %cst {dimension_numbers = #tpu.dot_dimension_numbers<[1], [0], [0], [1], [0, 0, 1, 1], [], []>} : vector<8x48xf32>, vector<48x128xf32>, vector<8x128xf32> -> vector<8x128xf32>
    %c304 = arith.constant 304 : index
    %c0_3 = arith.constant 0 : index
    %3 = vector.load %arg2[%c304, %c0_3] : memref<312x128xf32, #tpu.memory_space<vmem>>, vector<1x128xf32>
    %4 = vector.broadcast %3 : vector<1x128xf32> to vector<8x128xf32>
    %5 = arith.addf %2, %4 : vector<8x128xf32>
    %cst_4 = arith.constant 0.000000e+00 : f32
    %6 = vector.broadcast %cst_4 : f32 to vector<8x128xf32>
    %7 = arith.maximumf %5, %6 : vector<8x128xf32>
    %c48 = arith.constant 48 : index
    %c0_5 = arith.constant 0 : index
    %8 = vector.load %arg2[%c48, %c0_5] : memref<312x128xf32, #tpu.memory_space<vmem>>, vector<128x128xf32>
    %cst_6 = arith.constant dense<0.000000e+00> : vector<8x128xf32>
    %9 = tpu.matmul %7, %8, %cst_6 {dimension_numbers = #tpu.dot_dimension_numbers<[1], [0], [0], [1], [0, 0, 1, 1], [], []>} : vector<8x128xf32>, vector<128x128xf32>, vector<8x128xf32> -> vector<8x128xf32>
    %c305 = arith.constant 305 : index
    %c0_7 = arith.constant 0 : index
    %10 = vector.load %arg2[%c305, %c0_7] : memref<312x128xf32, #tpu.memory_space<vmem>>, vector<1x128xf32>
    %11 = vector.broadcast %10 : vector<1x128xf32> to vector<8x128xf32>
    %12 = arith.addf %9, %11 : vector<8x128xf32>
    %cst_8 = arith.constant 0.000000e+00 : f32
    %13 = vector.broadcast %cst_8 : f32 to vector<8x128xf32>
    %14 = arith.maximumf %12, %13 : vector<8x128xf32>
    %c176 = arith.constant 176 : index
    %c0_9 = arith.constant 0 : index
    %15 = vector.load %arg2[%c176, %c0_9] : memref<312x128xf32, #tpu.memory_space<vmem>>, vector<128x128xf32>
    %cst_10 = arith.constant dense<0.000000e+00> : vector<8x128xf32>
    %16 = tpu.matmul %14, %15, %cst_10 {dimension_numbers = #tpu.dot_dimension_numbers<[1], [0], [0], [1], [0, 0, 1, 1], [], []>} : vector<8x128xf32>, vector<128x128xf32>, vector<8x128xf32> -> vector<8x128xf32>
    %c306 = arith.constant 306 : index
    %c0_11 = arith.constant 0 : index
    %17 = vector.load %arg2[%c306, %c0_11] : memref<312x128xf32, #tpu.memory_space<vmem>>, vector<1x128xf32>
    %18 = vector.broadcast %17 : vector<1x128xf32> to vector<8x128xf32>
    %19 = arith.addf %16, %18 : vector<8x128xf32>
    %c0_12 = arith.constant 0 : index
    %c0_13 = arith.constant 0 : index
    %20 = vector.load %arg3[%c0_12, %c0_13] : memref<8x128xf32, #tpu.memory_space<vmem>>, vector<8x128xf32>
    tpu.vector_store %arg3[%c0_12, %c0_13], %19 {strides = array<i32>} : memref<8x128xf32, #tpu.memory_space<vmem>>, vector<8x128xf32>,
    return
  }
  func.func @transform_0(%arg0: i32) -> (i32, i32) {
    %c0_i32 = arith.constant 0 : i32
    %c0_i32_0 = arith.constant 0 : i32
    return %arg0, %c0_i32 : i32, i32
  }
  func.func @transform_1(%arg0: i32) -> (i32, i32) {
    %c0_i32 = arith.constant 0 : i32
    %c0_i32_0 = arith.constant 0 : i32
    %c0_i32_1 = arith.constant 0 : i32
    return %c0_i32, %c0_i32_0 : i32, i32
  }
  func.func @transform_2(%arg0: i32) -> (i32, i32) {
    %c0_i32 = arith.constant 0 : i32
    %c0_i32_0 = arith.constant 0 : i32
    return %arg0, %c0_i32 : i32, i32
  }
}

</mosaic_0001>

<bundles_post_ra>
// kernel: tpu_custom_call.1
= control target key start
LH: loop header
LB: loop body
LE: loop exit
PB: predicated region body
PF: predicated region fallthrough
CT: control target
= control target key end

     0   :  { %7 = vsyncpa [#allocation3], 0  ;;  %s288_s0 = inlined_call_operand.hbm [shape: f32[8,48], index: 0, kind: input, shape index: {}]   ;;  %s289_s1 = inlined_call_operand.hbm [shape: f32[312,128], index: 1, kind: input, shape index: {}]   ;;  %s290_s2 = inlined_call_operand.hbm [shape: f32[8,128], index: 2, kind: output, shape index: {}]  }
   0x1   :  { %8 = vsyncpa [#allocation6], 0 }
   0x2   :  { %9 = vsyncpa [#allocation4], 0  ;;  %s15_s11 = sshll.u32 %s288_s0, 4  ;;  %s259_s12 = smov [#allocation2]   ;;  %s16_s11 = int_to_ptr.hbm [resolvable:$true] %s15_s11 }
   0x3   :  { %s17_s13 = sshll.u32 %s259_s12, 4  ;;  %s25_s16 = sshll.u32 %s289_s1, 4  ;;  %s18_s13 = int_to_ptr.vmem [resolvable:$true] %s17_s13  ;;  %s26_s16 = int_to_ptr.hbm [resolvable:$true] %s25_s16 }
   0x4   :  { %20 = dma.hbm_to_vmem [thread:$0]  %s16_s11, 128, %s18_s13, [#allocation3]  }
   0x5   :  { %s260_s17 = smov [#allocation5]   ;;  %s261_s19 = smov 128  }
   0x6   :  { %s27_s18 = sshll.u32 %s260_s17, 4  ;;  %s262_s20 = smov 8   ;;  %s28_s18 = int_to_ptr.vmem [resolvable:$true] %s27_s18 }
   0x7   :  { %33 = dma.hbm_to_vmem [thread:$0]  %s26_s16, 4992, %s28_s18, [#allocation6], %s261_s19, %s261_s19, %s262_s20  }
   0x8   :  { %253 = dma.done.wait [#allocation3], 128  }
   0x9   :  { %254 = vsyncadd [#allocation3], 4294967168 }
   0xa   :  { %255 = dma.done.wait [#allocation6], 4992  }
   0xb   :  { %256 = vsyncadd [#allocation6], 4294962304  ;;  %v48_v0 = vld [vmem:[#allocation5 + $0x28] sm:$0xff]  ;;  %v47_v1 = vld [vmem:[#allocation5 + $0x20] sm:$0xff]  ;;  %vm51_vm0 = vcmask 392192   ;;  %s263_s0 = smov [#allocation7]  }
   0xc   :  { %65 = vmatpush.msra.mxu0 %v48_v0  ;;  %v46_v2 = vld [vmem:[#allocation5 + $0x18] sm:$0xff]  ;;  %v91_v3 = vld [vmem:[#allocation5 + $0xa8] sm:$0xff]  ;;  %v90_v4 = vld [vmem:[#allocation5 + $0xa0] sm:$0xff]  ;;  %s159_s1 = sshll.u32 %s263_s0, 4  ;;  %s161_s23 = sshll.u32 %s290_s2, 4  ;;  %s160_s1 = int_to_ptr.vmem [resolvable:$true] %s159_s1  ;;  %s162_s23 = int_to_ptr.hbm [resolvable:$true] %s161_s23 }
   0xd   :  { %94 = vmatpush.msra.mxu1 %v91_v3  ;;  %v45_v5 = vld [vmem:[#allocation5 + $0x10] sm:$0xff]  ;;  %v89_v6 = vld [vmem:[#allocation5 + $0x98] sm:$0xff]  ;;  %v44_v7 = vld [vmem:[#allocation5 + $0x8] sm:$0xff] }
   0xe   :  { %66 = vmatpush.msra.mxu0 %v47_v1  ;;  %v88_v8 = vld [vmem:[#allocation5 + $0x90] sm:$0xff]  ;;  %v43_v9 = vld [vmem:[#allocation5] sm:$0xff]  ;;  %v87_v10 = vld [vmem:[#allocation5 + $0x88] sm:$0xff] }
   0xf   :  { %95 = vmatpush.msra.mxu1 %v90_v4  ;;  %v42_v11 = vld [vmem:[#allocation2] sm:$0xff]  ;;  %v86_v12 = vld [vmem:[#allocation5 + $0x80] sm:$0xff]  ;;  %v84_v14 = vld [vmem:[#allocation5 + $0x70] sm:$0xff] }
  0x10   :  { %67 = vmatpush.msra.mxu0 %v46_v2  ;;  %v85_v13 = vld [vmem:[#allocation5 + $0x78] sm:$0xff]  ;;  %v83_v15 = vld [vmem:[#allocation5 + $0x68] sm:$0xff]  ;;  %v82_v16 = vld [vmem:[#allocation5 + $0x60] sm:$0xff] }
  0x11   :  { %96 = vmatpush.msra.mxu1 %v89_v6  ;;  %v81_v17 = vld [vmem:[#allocation5 + $0x58] sm:$0xff]  ;;  %v80_v18 = vld [vmem:[#allocation5 + $0x50] sm:$0xff]  ;;  %v79_v19 = vld [vmem:[#allocation5 + $0x48] sm:$0xff] }
  0x12   :  { %68 = vmatpush.msra.mxu0 %v45_v5  ;;  %v78_v20 = vld [vmem:[#allocation5 + $0x40] sm:$0xff]  ;;  %v77_v21 = vld [vmem:[#allocation5 + $0x38] sm:$0xff]  ;;  %v76_v22 = vld [vmem:[#allocation5 + $0x30] sm:$0xff] }
  0x13   :  { %97 = vmatpush.msra.mxu1 %v88_v8  ;;  %v130_v23 = vld [vmem:[#allocation5 + $0x128] sm:$0xff]  ;;  %v129_v24 = vld [vmem:[#allocation5 + $0x120] sm:$0xff]  ;;  %v128_v25 = vld [vmem:[#allocation5 + $0x118] sm:$0xff] }
  0x14   :  { %69 = vmatpush.msra.mxu0 %v44_v7  ;;  %133 = vmatpush.msra.mxu2 %v130_v23  ;;  %v127_v26 = vld [vmem:[#allocation5 + $0x110] sm:$0xff]  ;;  %v126_v27 = vld [vmem:[#allocation5 + $0x108] sm:$0xff]  ;;  %v125_v28 = vld [vmem:[#allocation5 + $0x100] sm:$0xff] }
  0x15   :  { %98 = vmatpush.msra.mxu1 %v87_v10  ;;  %v124_v29 = vld [vmem:[#allocation5 + $0xf8] sm:$0xff]  ;;  %v123_v30 = vld [vmem:[#allocation5 + $0xf0] sm:$0xff]  ;;  %v122_v31 = vld [vmem:[#allocation5 + $0xe8] sm:$0xff] }
  0x16   :  { %70 = vmatpush.msra.mxu0 %v43_v9  ;;  %134 = vmatpush.msra.mxu2 %v129_v24  ;;  %v121_v32 = vld [vmem:[#allocation5 + $0xe0] sm:$0xff]  ;;  %v120_v33 = vld [vmem:[#allocation5 + $0xd8] sm:$0xff]  ;;  %v119_v34 = vld [vmem:[#allocation5 + $0xd0] sm:$0xff] }
  0x17   :  { %172 = vmatmul.msk.f32.vlgmr.msra.gmra.mxu0 %vm51_vm0, %v42_v11  ;;  %99 = vmatpush.msra.mxu1 %v86_v12  ;;  %v118_v35 = vld [vmem:[#allocation5 + $0xc8] sm:$0xff]  ;;  %v178_v36 = vld [vmem:[#allocation5 + $0x130] ss:$0 sm:$0xff]  ;;  %v117_v40 = vld [vmem:[#allocation5 + $0xc0] sm:$0xff] }
  0x18   :  { %135 = vmatpush.msra.mxu2 %v128_v25  ;;  %v116_v41 = vld [vmem:[#allocation5 + $0xb8] sm:$0xff]  ;;  %v115_v42 = vld [vmem:[#allocation5 + $0xb0] sm:$0xff] }
  0x19   :  { %100 = vmatpush.msra.mxu1 %v85_v13  ;;  %v179_v43 = vld [vmem:[#allocation5 + $0x131] ss:$0 sm:$0xff]  ;;  %v180_v47 = vld [vmem:[#allocation5 + $0x132] ss:$0 sm:$0xff] }
  0x1a   :  { %136 = vmatpush.msra.mxu2 %v127_v26 }
  0x1b   :  { %101 = vmatpush.msra.mxu1 %v84_v14 }
  0x1c   :  { %137 = vmatpush.msra.mxu2 %v126_v27 }
  0x1d   :  { %102 = vmatpush.msra.mxu1 %v83_v15 }
  0x1e   :  { %138 = vmatpush.msra.mxu2 %v125_v28 }
  0x1f   :  { %103 = vmatpush.msra.mxu1 %v82_v16 }
  0x20   :  { %139 = vmatpush.msra.mxu2 %v124_v29 }
  0x21   :  { %104 = vmatpush.msra.mxu1 %v81_v17 }
  0x22   :  { %140 = vmatpush.msra.mxu2 %v123_v30 }
  0x23   :  { %105 = vmatpush.msra.mxu1 %v80_v18 }
  0x24   :  { %141 = vmatpush.msra.mxu2 %v122_v31 }
  0x25   :  { %106 = vmatpush.msra.mxu1 %v79_v19 }
  0x26   :  { %142 = vmatpush.msra.mxu2 %v121_v32 }
  0x27   :  { %107 = vmatpush.msra.mxu1 %v78_v20 }
  0x28   :  { %143 = vmatpush.msra.mxu2 %v120_v33 }
  0x29   :  { %108 = vmatpush.msra.mxu1 %v77_v21 }
  0x2a   :  { %144 = vmatpush.msra.mxu2 %v119_v34 }
  0x2b   :  { %109 = vmatpush.msra.mxu1 %v76_v22 }
  0x2c   :  { %145 = vmatpush.msra.mxu2 %v118_v35 }
  0x2e   :  { %146 = vmatpush.msra.mxu2 %v117_v40 }
  0x30   :  { %147 = vmatpush.msra.mxu2 %v116_v41 }
  0x32   :  { %148 = vmatpush.msra.mxu2 %v115_v42 }
  0x94   :  { %v72_v37 = vpop.f32.mrf.mxu0 }
  0x95   :  { %v73_v38 = vadd.f32 %v178_v36, %v72_v37 }
  0x97   :  { %v75_v39 = vmax.f32 %v73_v38, 0.0 }
  0x99   :  { %110 = vmatmul.f32.vlgmr.msra.gmra.mxu1 %v75_v39 }
 0x116   :  { %v111_v44 = vpop.f32.mrf.mxu1 }
 0x117   :  { %v112_v45 = vadd.f32 %v179_v43, %v111_v44 }
 0x119   :  { %v114_v46 = vmax.f32 %v112_v45, 0.0 }
 0x11b   :  { %149 = vmatmul.f32.vlgmr.msra.gmra.mxu2 %v114_v46 }
 0x19e   :  { %v150_v48 = vpop.f32.mrf.mxu2 }
 0x19f   :  { %v151_v49 = vadd.f32 %v180_v47, %v150_v48 }
 0x1a1   :  { %153 = vst [vmem:[#allocation7] sm:$0xff] %v151_v49 }
 0x1a2   :  { %164 = dma.vmem_to_hbm [thread:$0]  %s160_s1, 128, %s162_s23, [#allocation4]  }
 0x1a3   :  { %257 = dma.done.wait [#allocation4], 128  }
 0x1a4   :  { %258 = vsyncadd [#allocation4], 4294967168 }
 0x1a5   :  { %169 = vsyncpa [#allocation3], 1 }
 0x1a6   :  { %170 = vsyncpa [#allocation6], 1 }
 0x1a7   :  { %171 = vsyncpa [#allocation4], 1 }

</bundles_post_ra>
